<compile_context>
chip_gen: v7x
topology: tpu7x:2x2x1
jax: 0.10.0
libtpu: 0.0.40
codegen_flags: <defaults>
</compile_context>

<pallas_src>
import functools

import jax
import jax.numpy as jnp
from jax.experimental import pallas as pl
from jax.experimental.pallas import tpu as pltpu

_LANE = 128


def _round_up(n, m):
    return ((n + m - 1) // m) * m


def _leaky_relu(x, negative_slope=0.01):
    # matches torch.nn.functional.leaky_relu default slope
    return jnp.where(x > 0, x, negative_slope * x)


def _gru_policy_kernel(x_ref, h_ref, w1_ref, w2_ref, w3_ref, wi_ref, wh_ref,
                       b_ref, out_ref, hnew_ref, *, hidden_dim, gate_stride,
                       out_pad):
    H = hidden_dim
    Hp = gate_stride

    x = x_ref[...]
    h = h_ref[...]

    # Hidden-path fused gate matmul first: depends only on h, so the LLO
    # scheduler can overlap its MXU drain with fc1/fc2 below.
    gh = jnp.dot(h, wh_ref[...], preferred_element_type=jnp.float32)

    # Packed biases (one small VMEM array, rows zero-padded to lane width).
    b1   = b_ref[0:1, :H]
    b2   = b_ref[1:2, :H]
    b3   = b_ref[2:3, :out_pad]
    b_r  = b_ref[3:4, :H]       # = b_ir + b_hr  (pre-combined host-side)
    b_z  = b_ref[4:5, :H]       # = b_iz + b_hz
    b_in = b_ref[5:6, :H]
    b_hn = b_ref[6:7, :H]       # must stay separate (inside r-multiplied term)

    # fc1 / fc2 + leaky_relu
    h1 = _leaky_relu(
        jnp.dot(x, w1_ref[...], preferred_element_type=jnp.float32) + b1)
    h2 = _leaky_relu(
        jnp.dot(h1, w2_ref[...], preferred_element_type=jnp.float32) + b2)

    # Input-path fused gate matmul: one (TB,H) x (H,3*Hp) push for r|z|n.
    gi = jnp.dot(h2, wi_ref[...], preferred_element_type=jnp.float32)

    # GRUCell (PyTorch semantics), gate blocks are 128-lane aligned slices.
    r = jax.nn.sigmoid(gi[:, 0:H] + gh[:, 0:H] + b_r)
    z = jax.nn.sigmoid(gi[:, Hp:Hp + H] + gh[:, Hp:Hp + H] + b_z)
    n = jnp.tanh(gi[:, 2 * Hp:2 * Hp + H] + b_in
                 + r * (gh[:, 2 * Hp:2 * Hp + H] + b_hn))

    h_new = n + z * (h - n)     # == (1 - z) * n + z * h, one fewer multiply

    # fc3 (lane-padded to out_pad columns) + leaky_relu; dense lane store.
    out = _leaky_relu(
        jnp.dot(h_new, w3_ref[...], preferred_element_type=jnp.float32) + b3)

    out_ref[...] = out
    hnew_ref[...] = h_new


def gru_policy_forward(x, h, packed):
    """x: (B, input_dim), h: (B, hidden_dim). Returns (out, h_new)."""
    B, input_dim = x.shape
    H = packed["hidden_dim"]
    Hp = packed["gate_stride"]
    out_dim = packed["out_dim"]
    OutP = packed["out_pad"]
    BW = packed["bias_width"]

    # Batch tile: full batch for small B; 256-row tiles (and a parallel grid
    # axis -> megacore sharding on v7x) for large batches.
    TB = B if B <= 256 else 256
    grid = (pl.cdiv(B, TB),)

    def resident(shape):
        # Weights/biases: same block for every grid step -> stay VMEM-resident.
        return pl.BlockSpec(shape, lambda i: (0, 0))

    def batched(width):
        return pl.BlockSpec((TB, width), lambda i: (i, 0))

    kernel = functools.partial(_gru_policy_kernel, hidden_dim=H,
                               gate_stride=Hp, out_pad=OutP)

    out_p, h_new = pl.pallas_call(
        kernel,
        grid=grid,
        in_specs=[
            batched(input_dim),           # x
            batched(H),                   # h
            resident((input_dim, H)),     # w1
            resident((H, H)),             # w2
            resident((H, OutP)),          # w3 (lane-padded)
            resident((H, 3 * Hp)),        # fused input-gate weights  [r|z|n]
            resident((H, 3 * Hp)),        # fused hidden-gate weights [r|z|n]
            resident((8, BW)),            # packed biases
        ],
        out_specs=(
            batched(OutP),                # out (lane-padded)
            batched(H),                   # h_new
        ),
        out_shape=(
            jax.ShapeDtypeStruct((B, OutP), jnp.float32),
            jax.ShapeDtypeStruct((B, H), jnp.float32),
        ),
        compiler_params=pltpu.CompilerParams(
            dimension_semantics=("parallel",)),
    )(x, h, packed["w1"], packed["w2"], packed["w3"], packed["wi"],
      packed["wh"], packed["biases"])

    # TODO(synk): for multi-step rollouts, fold the time loop into the kernel
    # (grid axis over T with resident weights / input_output_aliases on h)
    # instead of one pallas_call per step.
    return out_p[:, :out_dim], h_new


def init_params(input_dim, hidden_dim, out_dim, key):
    """Deterministic synthetic parameters (uniform +-1/sqrt(fan_in), like torch).

    Weights stored transposed vs. PyTorch, i.e. (in_features, out_features);
    biases stored as 1-D (out_features,)."""
    ks = jax.random.split(key, 20)

    def unif(k, shape, fan_in):
        bound = 1.0 / jnp.sqrt(jnp.float32(fan_in))
        return jax.random.uniform(k, shape, jnp.float32, -bound, bound)

    H = hidden_dim
    p = {}
    p["w1"] = unif(ks[0], (input_dim, H), input_dim)
    p["b1"] = unif(ks[1], (H,), input_dim)
    p["w2"] = unif(ks[2], (H, H), H)
    p["b2"] = unif(ks[3], (H,), H)
    p["w3"] = unif(ks[4], (H, out_dim), H)
    p["b3"] = unif(ks[5], (out_dim,), H)
    # GRUCell per-gate weights, stored transposed as (in, hidden).
    p["w_ir"] = unif(ks[6], (H, H), H)
    p["w_iz"] = unif(ks[7], (H, H), H)
    p["w_in"] = unif(ks[8], (H, H), H)
    p["w_hr"] = unif(ks[9], (H, H), H)
    p["w_hz"] = unif(ks[10], (H, H), H)
    p["w_hn"] = unif(ks[11], (H, H), H)
    p["b_ir"] = unif(ks[12], (H,), H)
    p["b_iz"] = unif(ks[13], (H,), H)
    p["b_in"] = unif(ks[14], (H,), H)
    p["b_hr"] = unif(ks[15], (H,), H)
    p["b_hz"] = unif(ks[16], (H,), H)
    p["b_hn"] = unif(ks[17], (H,), H)
    return p


def pack_params(p, input_dim, hidden_dim, out_dim):
    """Host-side packing: fuse gate weights, combine/collect biases, pad fc3."""
    H = hidden_dim
    Hp = _round_up(H, _LANE)          # per-gate lane-aligned stride
    OutP = _round_up(out_dim, _LANE)  # lane-dense fc3 output width
    BW = max(Hp, OutP)                # bias-pack lane width

    wi = jnp.zeros((H, 3 * Hp), jnp.float32)
    wi = (wi.at[:, 0:H].set(p["w_ir"])
            .at[:, Hp:Hp + H].set(p["w_iz"])
            .at[:, 2 * Hp:2 * Hp + H].set(p["w_in"]))
    wh = jnp.zeros((H, 3 * Hp), jnp.float32)
    wh = (wh.at[:, 0:H].set(p["w_hr"])
            .at[:, Hp:Hp + H].set(p["w_hz"])
            .at[:, 2 * Hp:2 * Hp + H].set(p["w_hn"]))

    w3p = jnp.zeros((H, OutP), jnp.float32).at[:, :out_dim].set(p["w3"])

    biases = jnp.zeros((8, BW), jnp.float32)
    biases = (biases.at[0, :H].set(p["b1"])
                    .at[1, :H].set(p["b2"])
                    .at[2, :out_dim].set(p["b3"])
                    .at[3, :H].set(p["b_ir"] + p["b_hr"])
                    .at[4, :H].set(p["b_iz"] + p["b_hz"])
                    .at[5, :H].set(p["b_in"])
                    .at[6, :H].set(p["b_hn"]))

    return dict(
        w1=p["w1"], w2=p["w2"], w3=w3p, wi=wi, wh=wh, biases=biases,
        hidden_dim=H, gate_stride=Hp, out_dim=out_dim, out_pad=OutP,
        bias_width=BW)


def gru_policy_reference(x, h, p):
    """Pure-JAX reference (mirrors PyTorch GruPolicy.forward)."""
    h1 = _leaky_relu(x @ p["w1"] + p["b1"])
    h2 = _leaky_relu(h1 @ p["w2"] + p["b2"])
    r = jax.nn.sigmoid(h2 @ p["w_ir"] + p["b_ir"] + h @ p["w_hr"] + p["b_hr"])
    z = jax.nn.sigmoid(h2 @ p["w_iz"] + p["b_iz"] + h @ p["w_hz"] + p["b_hz"])
    n = jnp.tanh(h2 @ p["w_in"] + p["b_in"] + r * (h @ p["w_hn"] + p["b_hn"]))
    h_new = (1.0 - z) * n + z * h
    out = _leaky_relu(h_new @ p["w3"] + p["b3"])
    return out, h_new


if __name__ == "__main__":
    # Small shapes consistent with the module: batch of agent observations.
    batch = 8
    input_dim = 16
    hidden_dim = 32
    out_dim = 8

    key = jax.random.PRNGKey(0)
    k_x, k_h, k_p = jax.random.split(key, 3)

    x = jax.random.normal(k_x, (batch, input_dim), dtype=jnp.float32)
    # (module's init_hidden_state hardcodes width 128, incompatible with
    #  GRUCell(hidden_dim); we use a functional (B, hidden_dim) hidden state.
    #  A non-zero h exercises the z*h / r*(W_hn h) paths.)
    h0 = 0.1 * jax.random.normal(k_h, (batch, hidden_dim), dtype=jnp.float32)

    params = init_params(input_dim, hidden_dim, out_dim, k_p)
    packed = pack_params(params, input_dim, hidden_dim, out_dim)

    out, h_new = gru_policy_forward(x, h0, packed)
    jax.block_until_ready((out, h_new))

    assert out.shape == (batch, out_dim)
    assert h_new.shape == (batch, hidden_dim)

    ref_out, ref_h = gru_policy_reference(x, h0, params)
    assert jnp.allclose(out, ref_out, atol=2e-2, rtol=2e-2)
    assert jnp.allclose(h_new, ref_h, atol=2e-2, rtol=2e-2)

    print("KERNEL_OK")
</pallas_src>

<mosaic_0001>
module attributes {stable_mosaic.version = 11 : i64} {
  func.func @_gru_policy_kernel(%arg0: i32, %arg1: memref<8x16xf32, #tpu.memory_space<vmem>>, %arg2: memref<8x32xf32, #tpu.memory_space<vmem>>, %arg3: memref<16x32xf32, #tpu.memory_space<vmem>>, %arg4: memref<32x32xf32, #tpu.memory_space<vmem>>, %arg5: memref<32x128xf32, #tpu.memory_space<vmem>>, %arg6: memref<32x384xf32, #tpu.memory_space<vmem>>, %arg7: memref<32x384xf32, #tpu.memory_space<vmem>>, %arg8: memref<8x128xf32, #tpu.memory_space<vmem>>, %arg9: memref<8x128xf32, #tpu.memory_space<vmem>>, %arg10: memref<8x32xf32, #tpu.memory_space<vmem>>) attributes {dimension_semantics = [#tpu.dimension_semantics<parallel>], iteration_bounds = array<i64: 1>, scalar_prefetch = 0 : i64, scratch_operands = 0 : i64, tpu.core_type = #tpu.core_type<tc>, window_params = [{transform_indices = @transform_0, window_bounds = array<i64: 8, 16>}, {transform_indices = @transform_1, window_bounds = array<i64: 8, 32>}, {pipeline_mode = #tpu.pipeline_mode<synchronous>, transform_indices = @transform_2, window_bounds = array<i64: 16, 32>}, {pipeline_mode = #tpu.pipeline_mode<synchronous>, transform_indices = @transform_3, window_bounds = array<i64: 32, 32>}, {pipeline_mode = #tpu.pipeline_mode<synchronous>, transform_indices = @transform_4, window_bounds = array<i64: 32, 128>}, {pipeline_mode = #tpu.pipeline_mode<synchronous>, transform_indices = @transform_5, window_bounds = array<i64: 32, 384>}, {pipeline_mode = #tpu.pipeline_mode<synchronous>, transform_indices = @transform_6, window_bounds = array<i64: 32, 384>}, {pipeline_mode = #tpu.pipeline_mode<synchronous>, transform_indices = @transform_7, window_bounds = array<i64: 8, 128>}, {transform_indices = @transform_8, window_bounds = array<i64: 8, 128>}, {transform_indices = @transform_9, window_bounds = array<i64: 8, 32>}]} {
    %c0 = arith.constant 0 : index
    %c0_0 = arith.constant 0 : index
    %0 = vector.load %arg1[%c0, %c0_0] : memref<8x16xf32, #tpu.memory_space<vmem>>, vector<8x16xf32>
    %c0_1 = arith.constant 0 : index
    %c0_2 = arith.constant 0 : index
    %1 = vector.load %arg2[%c0_1, %c0_2] : memref<8x32xf32, #tpu.memory_space<vmem>>, vector<8x32xf32>
    %c0_3 = arith.constant 0 : index
    %c0_4 = arith.constant 0 : index
    %2 = vector.load %arg7[%c0_3, %c0_4] : memref<32x384xf32, #tpu.memory_space<vmem>>, vector<32x384xf32>
    %cst = arith.constant dense<0.000000e+00> : vector<8x384xf32>
    %3 = tpu.matmul %1, %2, %cst {dimension_numbers = #tpu.dot_dimension_numbers<[1], [0], [0], [1], [0, 0, 1, 1], [], []>} : vector<8x32xf32>, vector<32x384xf32>, vector<8x384xf32> -> vector<8x384xf32>
    %c0_5 = arith.constant 0 : index
    %c0_6 = arith.constant 0 : index
    %4 = vector.load %arg8[%c0_5, %c0_6] : memref<8x128xf32, #tpu.memory_space<vmem>>, vector<1x32xf32>
    %c1 = arith.constant 1 : index
    %c0_7 = arith.constant 0 : index
    %5 = vector.load %arg8[%c1, %c0_7] : memref<8x128xf32, #tpu.memory_space<vmem>>, vector<1x32xf32>
    %c2 = arith.constant 2 : index
    %c0_8 = arith.constant 0 : index
    %6 = vector.load %arg8[%c2, %c0_8] : memref<8x128xf32, #tpu.memory_space<vmem>>, vector<1x128xf32>
    %c3 = arith.constant 3 : index
    %c0_9 = arith.constant 0 : index
    %7 = vector.load %arg8[%c3, %c0_9] : memref<8x128xf32, #tpu.memory_space<vmem>>, vector<1x32xf32>
    %c4 = arith.constant 4 : index
    %c0_10 = arith.constant 0 : index
    %8 = vector.load %arg8[%c4, %c0_10] : memref<8x128xf32, #tpu.memory_space<vmem>>, vector<1x32xf32>
    %c5 = arith.constant 5 : index
    %c0_11 = arith.constant 0 : index
    %9 = vector.load %arg8[%c5, %c0_11] : memref<8x128xf32, #tpu.memory_space<vmem>>, vector<1x32xf32>
    %c6 = arith.constant 6 : index
    %c0_12 = arith.constant 0 : index
    %10 = vector.load %arg8[%c6, %c0_12] : memref<8x128xf32, #tpu.memory_space<vmem>>, vector<1x32xf32>
    %c0_13 = arith.constant 0 : index
    %c0_14 = arith.constant 0 : index
    %11 = vector.load %arg3[%c0_13, %c0_14] : memref<16x32xf32, #tpu.memory_space<vmem>>, vector<16x32xf32>
    %cst_15 = arith.constant dense<0.000000e+00> : vector<8x32xf32>
    %12 = tpu.matmul %0, %11, %cst_15 {dimension_numbers = #tpu.dot_dimension_numbers<[1], [0], [0], [1], [0, 0, 1, 1], [], []>} : vector<8x16xf32>, vector<16x32xf32>, vector<8x32xf32> -> vector<8x32xf32>
    %13 = vector.broadcast %4 : vector<1x32xf32> to vector<8x32xf32>
    %14 = arith.addf %12, %13 : vector<8x32xf32>
    %cst_16 = arith.constant 0.000000e+00 : f32
    %15 = vector.broadcast %cst_16 : f32 to vector<8x32xf32>
    %16 = arith.cmpf ogt, %14, %15 : vector<8x32xf32>
    %cst_17 = arith.constant 0.00999999977 : f32
    %17 = vector.broadcast %cst_17 : f32 to vector<8x32xf32>
    %18 = arith.mulf %17, %14 : vector<8x32xf32>
    %19 = arith.select %16, %14, %18 : vector<8x32xi1>, vector<8x32xf32>
    %c0_18 = arith.constant 0 : index
    %c0_19 = arith.constant 0 : index
    %20 = vector.load %arg4[%c0_18, %c0_19] : memref<32x32xf32, #tpu.memory_space<vmem>>, vector<32x32xf32>
    %cst_20 = arith.constant dense<0.000000e+00> : vector<8x32xf32>
    %21 = tpu.matmul %19, %20, %cst_20 {dimension_numbers = #tpu.dot_dimension_numbers<[1], [0], [0], [1], [0, 0, 1, 1], [], []>} : vector<8x32xf32>, vector<32x32xf32>, vector<8x32xf32> -> vector<8x32xf32>
    %22 = vector.broadcast %5 : vector<1x32xf32> to vector<8x32xf32>
    %23 = arith.addf %21, %22 : vector<8x32xf32>
    %cst_21 = arith.constant 0.000000e+00 : f32
    %24 = vector.broadcast %cst_21 : f32 to vector<8x32xf32>
    %25 = arith.cmpf ogt, %23, %24 : vector<8x32xf32>
    %cst_22 = arith.constant 0.00999999977 : f32
    %26 = vector.broadcast %cst_22 : f32 to vector<8x32xf32>
    %27 = arith.mulf %26, %23 : vector<8x32xf32>
    %28 = arith.select %25, %23, %27 : vector<8x32xi1>, vector<8x32xf32>
    %c0_23 = arith.constant 0 : index
    %c0_24 = arith.constant 0 : index
    %29 = vector.load %arg6[%c0_23, %c0_24] : memref<32x384xf32, #tpu.memory_space<vmem>>, vector<32x384xf32>
    %cst_25 = arith.constant dense<0.000000e+00> : vector<8x384xf32>
    %30 = tpu.matmul %28, %29, %cst_25 {dimension_numbers = #tpu.dot_dimension_numbers<[1], [0], [0], [1], [0, 0, 1, 1], [], []>} : vector<8x32xf32>, vector<32x384xf32>, vector<8x384xf32> -> vector<8x384xf32>
    %31 = vector.extract_strided_slice %30 {offsets = [0, 0], sizes = [8, 32], strides = [1, 1]} : vector<8x384xf32> to vector<8x32xf32>
    %32 = vector.extract_strided_slice %3 {offsets = [0, 0], sizes = [8, 32], strides = [1, 1]} : vector<8x384xf32> to vector<8x32xf32>
    %33 = arith.addf %31, %32 : vector<8x32xf32>
    %34 = vector.broadcast %7 : vector<1x32xf32> to vector<8x32xf32>
    %35 = arith.addf %33, %34 : vector<8x32xf32>
    %36 = arith.negf %35 : vector<8x32xf32>
    %37 = math.exp %36 : vector<8x32xf32>
    %cst_26 = arith.constant 1.000000e+00 : f32
    %38 = vector.broadcast %cst_26 : f32 to vector<8x32xf32>
    %39 = arith.addf %38, %37 : vector<8x32xf32>
    %40 = arith.divf %38, %39 : vector<8x32xf32>
    %41 = vector.extract_strided_slice %30 {offsets = [0, 128], sizes = [8, 32], strides = [1, 1]} : vector<8x384xf32> to vector<8x32xf32>
    %42 = vector.extract_strided_slice %3 {offsets = [0, 128], sizes = [8, 32], strides = [1, 1]} : vector<8x384xf32> to vector<8x32xf32>
    %43 = arith.addf %41, %42 : vector<8x32xf32>
    %44 = vector.broadcast %8 : vector<1x32xf32> to vector<8x32xf32>
    %45 = arith.addf %43, %44 : vector<8x32xf32>
    %46 = arith.negf %45 : vector<8x32xf32>
    %47 = math.exp %46 : vector<8x32xf32>
    %cst_27 = arith.constant 1.000000e+00 : f32
    %48 = vector.broadcast %cst_27 : f32 to vector<8x32xf32>
    %49 = arith.addf %48, %47 : vector<8x32xf32>
    %50 = arith.divf %48, %49 : vector<8x32xf32>
    %51 = vector.extract_strided_slice %30 {offsets = [0, 256], sizes = [8, 32], strides = [1, 1]} : vector<8x384xf32> to vector<8x32xf32>
    %52 = vector.broadcast %9 : vector<1x32xf32> to vector<8x32xf32>
    %53 = arith.addf %51, %52 : vector<8x32xf32>
    %54 = vector.extract_strided_slice %3 {offsets = [0, 256], sizes = [8, 32], strides = [1, 1]} : vector<8x384xf32> to vector<8x32xf32>
    %55 = vector.broadcast %10 : vector<1x32xf32> to vector<8x32xf32>
    %56 = arith.addf %54, %55 : vector<8x32xf32>
    %57 = arith.mulf %40, %56 : vector<8x32xf32>
    %58 = arith.addf %53, %57 : vector<8x32xf32>
    %59 = math.tanh %58 : vector<8x32xf32>
    %60 = arith.subf %1, %59 : vector<8x32xf32>
    %61 = arith.mulf %50, %60 : vector<8x32xf32>
    %62 = arith.addf %59, %61 : vector<8x32xf32>
    %c0_28 = arith.constant 0 : index
    %c0_29 = arith.constant 0 : index
    %63 = vector.load %arg5[%c0_28, %c0_29] : memref<32x128xf32, #tpu.memory_space<vmem>>, vector<32x128xf32>
    %cst_30 = arith.constant dense<0.000000e+00> : vector<8x128xf32>
    %64 = tpu.matmul %62, %63, %cst_30 {dimension_numbers = #tpu.dot_dimension_numbers<[1], [0], [0], [1], [0, 0, 1, 1], [], []>} : vector<8x32xf32>, vector<32x128xf32>, vector<8x128xf32> -> vector<8x128xf32>
    %65 = vector.broadcast %6 : vector<1x128xf32> to vector<8x128xf32>
    %66 = arith.addf %64, %65 : vector<8x128xf32>
    %cst_31 = arith.constant 0.000000e+00 : f32
    %67 = vector.broadcast %cst_31 : f32 to vector<8x128xf32>
    %68 = arith.cmpf ogt, %66, %67 : vector<8x128xf32>
    %cst_32 = arith.constant 0.00999999977 : f32
    %69 = vector.broadcast %cst_32 : f32 to vector<8x128xf32>
    %70 = arith.mulf %69, %66 : vector<8x128xf32>
    %71 = arith.select %68, %66, %70 : vector<8x128xi1>, vector<8x128xf32>
    %c0_33 = arith.constant 0 : index
    %c0_34 = arith.constant 0 : index
    %72 = vector.load %arg9[%c0_33, %c0_34] : memref<8x128xf32, #tpu.memory_space<vmem>>, vector<8x128xf32>
    tpu.vector_store %arg9[%c0_33, %c0_34], %71 {strides = array<i32>} : memref<8x128xf32, #tpu.memory_space<vmem>>, vector<8x128xf32>,
    %c0_35 = arith.constant 0 : index
    %c0_36 = arith.constant 0 : index
    %73 = vector.load %arg10[%c0_35, %c0_36] : memref<8x32xf32, #tpu.memory_space<vmem>>, vector<8x32xf32>
    tpu.vector_store %arg10[%c0_35, %c0_36], %62 {strides = array<i32>} : memref<8x32xf32, #tpu.memory_space<vmem>>, vector<8x32xf32>,
    return
  }
  func.func @transform_0(%arg0: i32) -> (i32, i32) {
    %c0_i32 = arith.constant 0 : i32
    %c0_i32_0 = arith.constant 0 : i32
    return %arg0, %c0_i32 : i32, i32
  }
  func.func @transform_1(%arg0: i32) -> (i32, i32) {
    %c0_i32 = arith.constant 0 : i32
    %c0_i32_0 = arith.constant 0 : i32
    return %arg0, %c0_i32 : i32, i32
  }
  func.func @transform_2(%arg0: i32) -> (i32, i32) {
    %c0_i32 = arith.constant 0 : i32
    %c0_i32_0 = arith.constant 0 : i32
    %c0_i32_1 = arith.constant 0 : i32
    return %c0_i32, %c0_i32_0 : i32, i32
  }
  func.func @transform_3(%arg0: i32) -> (i32, i32) {
    %c0_i32 = arith.constant 0 : i32
    %c0_i32_0 = arith.constant 0 : i32
    %c0_i32_1 = arith.constant 0 : i32
    return %c0_i32, %c0_i32_0 : i32, i32
  }
  func.func @transform_4(%arg0: i32) -> (i32, i32) {
    %c0_i32 = arith.constant 0 : i32
    %c0_i32_0 = arith.constant 0 : i32
    %c0_i32_1 = arith.constant 0 : i32
    return %c0_i32, %c0_i32_0 : i32, i32
  }
  func.func @transform_5(%arg0: i32) -> (i32, i32) {
    %c0_i32 = arith.constant 0 : i32
    %c0_i32_0 = arith.constant 0 : i32
    %c0_i32_1 = arith.constant 0 : i32
    return %c0_i32, %c0_i32_0 : i32, i32
  }
  func.func @transform_6(%arg0: i32) -> (i32, i32) {
    %c0_i32 = arith.constant 0 : i32
    %c0_i32_0 = arith.constant 0 : i32
    %c0_i32_1 = arith.constant 0 : i32
    return %c0_i32, %c0_i32_0 : i32, i32
  }
  func.func @transform_7(%arg0: i32) -> (i32, i32) {
    %c0_i32 = arith.constant 0 : i32
    %c0_i32_0 = arith.constant 0 : i32
    %c0_i32_1 = arith.constant 0 : i32
    return %c0_i32, %c0_i32_0 : i32, i32
  }
  func.func @transform_8(%arg0: i32) -> (i32, i32) {
    %c0_i32 = arith.constant 0 : i32
    %c0_i32_0 = arith.constant 0 : i32
    return %arg0, %c0_i32 : i32, i32
  }
  func.func @transform_9(%arg0: i32) -> (i32, i32) {
    %c0_i32 = arith.constant 0 : i32
    %c0_i32_0 = arith.constant 0 : i32
    return %arg0, %c0_i32 : i32, i32
  }
}

</mosaic_0001>

<bundles_post_ra>
// kernel: tpu_custom_call.1
= control target key start
LH: loop header
LB: loop body
LE: loop exit
PB: predicated region body
PF: predicated region fallthrough
CT: control target
= control target key end

     0   :  { %15 = vsyncpa [#allocation3], 0  ;;  %s1388_s0 = inlined_call_operand.hbm [shape: f32[8,16], index: 0, kind: input, shape index: {}]   ;;  %s1389_s1 = inlined_call_operand.hbm [shape: f32[8,32], index: 1, kind: input, shape index: {}]   ;;  %s1390_s2 = inlined_call_operand.hbm [shape: f32[16,32], index: 2, kind: input, shape index: {}]   ;;  %s1391_s3 = inlined_call_operand.hbm [shape: f32[32,32], index: 3, kind: input, shape index: {}]   ;;  %s1392_s4 = inlined_call_operand.hbm [shape: f32[32,128], index: 4, kind: input, shape index: {}]   ;;  %s1393_s5 = inlined_call_operand.hbm [shape: f32[32,384], index: 5, kind: input, shape index: {}]   ;;  %s1394_s6 = inlined_call_operand.hbm [shape: f32[32,384], index: 6, kind: input, shape index: {}]   ;;  %s1395_s7 = inlined_call_operand.vmem [shape: f32[8,128], index: 7, kind: input, shape index: {}]   ;;  %s1396_s8 = inlined_call_operand.hbm [shape: f32[8,128], index: 8, kind: output, shape index: {0}]   ;;  %s1397_s9 = inlined_call_operand.hbm [shape: f32[8,32], index: 9, kind: output, shape index: {1}]  }
   0x1   :  { %16 = vsyncpa [#allocation6], 0 }
   0x2   :  { %17 = vsyncpa [#allocation9], 0 }
   0x3   :  { %18 = vsyncpa [#allocation12], 0 }
   0x4   :  { %19 = vsyncpa [#allocation4], 0 }
   0x5   :  { %20 = vsyncpa [#allocation16], 0  ;;  %s1142_s30 = smov [#allocation5]   ;;  %s932_s13 = scalar_lea.hbm %s1389_s1, 128 }
   0x6   :  { %s37_s10 = sshll.u32 %s1142_s30, 4  ;;  %p933_p0 = scmp.ne.s32.totalorder %s1389_s1, %s932_s13  ;;  %s38_s10 = int_to_ptr.vmem [resolvable:$true] %s37_s10 }
   0x7   :  { %p936_p1 = scmp.lt.u32.totalorder %s932_s13, %s1389_s1 }
   0x9   :  { %p938_p2 = pnand %p936_p1, %p933_p0 }
   0xb   :  { %941 = shalt.err (!%p938_p2)
}
   0xc   :  { %s942_s18 = scalar_lea.vmem %s38_s10, 128  ;;  %p947_p4 = scmp.lt.s32.totalorder %s38_s10, %s38_s10 }
   0xd   :  { %p943_p3 = scmp.ne.s32.totalorder %s38_s10, %s942_s18  ;;  %p948_p5 = scmp.lt.s32.totalorder %s942_s18, %s942_s18 }
   0xf   :  { %p949_p6 = por %p948_p5, %p947_p4 }
  0x11   :  { %p950_p7 = pnand %p949_p6, %p943_p3 }
  0x13   :  { %953 = shalt.err (!%p950_p7)
}
  0x14   :  { %40 = dma.hbm_to_vmem [thread:$0]  %s1389_s1, 128, %s38_s10, [#allocation6]  }
  0x15   :  { %s1143_s21 = smov [#allocation8]   ;;  %s1144_s23 = smov [#allocation11]  }
  0x16   :  { %s58_s22 = sshll.u32 %s1143_s21, 4  ;;  %s82_s24 = sshll.u32 %s1144_s23, 4  ;;  %s59_s22 = int_to_ptr.vmem [resolvable:$true] %s58_s22  ;;  %s83_s24 = int_to_ptr.vmem [resolvable:$true] %s82_s24 }
  0x17   :  { %s954_s27 = scalar_lea.hbm %s1391_s3, 512 }
  0x18   :  { %p955_p8 = scmp.ne.s32.totalorder %s1391_s3, %s954_s27  ;;  %p958_p9 = scmp.lt.u32.totalorder %s954_s27, %s1391_s3 }
  0x1a   :  { %p960_p10 = pnand %p958_p9, %p955_p8 }
  0x1c   :  { %963 = shalt.err (!%p960_p10)
}
  0x1d   :  { %s964_s1 = scalar_lea.vmem %s59_s22, 512  ;;  %p969_p12 = scmp.lt.s32.totalorder %s59_s22, %s59_s22 }
  0x1e   :  { %p965_p11 = scmp.ne.s32.totalorder %s59_s22, %s964_s1  ;;  %p970_p13 = scmp.lt.s32.totalorder %s964_s1, %s964_s1 }
  0x20   :  { %p971_p0 = por %p970_p13, %p969_p12 }
  0x22   :  { %p972_p1 = pnand %p971_p0, %p965_p11 }
  0x24   :  { %975 = shalt.err (!%p972_p1)
}
  0x25   :  { %s1145_s10 = smov 128   ;;  %s1146_s12 = smov 8  }
  0x26   :  { %64 = dma.hbm_to_vmem [thread:$0]  %s1391_s3, 512, %s59_s22, [#allocation9], %s1145_s10, %s1145_s10, %s1146_s12  }
  0x27   :  { %s976_s17 = scalar_lea.hbm %s1393_s5, 1536 }
  0x28   :  { %p977_p2 = scmp.ne.s32.totalorder %s1393_s5, %s976_s17  ;;  %p980_p3 = scmp.lt.u32.totalorder %s976_s17, %s1393_s5 }
  0x2a   :  { %p982_p4 = pnand %p980_p3, %p977_p2 }
  0x2c   :  { %985 = shalt.err (!%p982_p4)
}
  0x2d   :  { %s986_s23 = scalar_lea.vmem %s83_s24, 1536  ;;  %p991_p6 = scmp.lt.s32.totalorder %s83_s24, %s83_s24 }
  0x2e   :  { %p987_p5 = scmp.ne.s32.totalorder %s83_s24, %s986_s23  ;;  %p992_p7 = scmp.lt.s32.totalorder %s986_s23, %s986_s23 }
  0x30   :  { %p993_p8 = por %p992_p7, %p991_p6 }
  0x32   :  { %p994_p9 = pnand %p993_p8, %p987_p5 }
  0x34   :  { %997 = shalt.err (!%p994_p9)
}
  0x35   :  { %s1147_s3 = smov 384   ;;  %s1148_s22 = smov 24  }
  0x36   :  { %88 = dma.hbm_to_vmem [thread:$0]  %s1393_s5, 1536, %s83_s24, [#allocation12], %s1147_s3, %s1147_s3, %s1148_s22  }
  0x37   :  { %s1149_s27 = smov [#allocation2]   ;;  %s1150_s29 = smov [#allocation7]  }
  0x38   :  { %s27_s28 = sshll.u32 %s1149_s27, 4  ;;  %s46_s30 = sshll.u32 %s1150_s29, 4  ;;  %s28_s28 = int_to_ptr.vmem [resolvable:$true] %s27_s28  ;;  %s47_s30 = int_to_ptr.vmem [resolvable:$true] %s46_s30 }
  0x39   :  { %s998_s13 = scalar_lea.hbm %s1388_s0, 128 }
  0x3a   :  { %p999_p10 = scmp.ne.s32.totalorder %s1388_s0, %s998_s13  ;;  %p1002_p11 = scmp.lt.u32.totalorder %s998_s13, %s1388_s0 }
  0x3c   :  { %p1004_p12 = pnand %p1002_p11, %p999_p10 }
  0x3e   :  { %1007 = shalt.err (!%p1004_p12)
}
  0x3f   :  { %s1008_s5 = scalar_lea.vmem %s28_s28, 128  ;;  %p1013_p0 = scmp.lt.s32.totalorder %s28_s28, %s28_s28 }
  0x40   :  { %p1009_p13 = scmp.ne.s32.totalorder %s28_s28, %s1008_s5  ;;  %p1014_p1 = scmp.lt.s32.totalorder %s1008_s5, %s1008_s5 }
  0x42   :  { %p1015_p2 = por %p1014_p1, %p1013_p0 }
  0x44   :  { %p1016_p3 = pnand %p1015_p2, %p1009_p13 }
  0x46   :  { %1019 = shalt.err (!%p1016_p3)
}
  0x47   :  { %30 = dma.hbm_to_vmem [thread:$0]  %s1388_s0, 128, %s28_s28, [#allocation3]  }
  0x48   :  { %s1020_s21 = scalar_lea.hbm %s1390_s2, 256 }
  0x49   :  { %p1021_p4 = scmp.ne.s32.totalorder %s1390_s2, %s1020_s21  ;;  %p1024_p5 = scmp.lt.u32.totalorder %s1020_s21, %s1390_s2 }
  0x4b   :  { %p1026_p6 = pnand %p1024_p5, %p1021_p4 }
  0x4d   :  { %1029 = shalt.err (!%p1026_p6)
}
  0x4e   :  { %s1030_s29 = scalar_lea.vmem %s47_s30, 256  ;;  %p1035_p8 = scmp.lt.s32.totalorder %s47_s30, %s47_s30 }
  0x4f   :  { %p1031_p7 = scmp.ne.s32.totalorder %s47_s30, %s1030_s29  ;;  %p1036_p9 = scmp.lt.s32.totalorder %s1030_s29, %s1030_s29 }
  0x51   :  { %p1037_p10 = por %p1036_p9, %p1035_p8 }
  0x53   :  { %p1038_p11 = pnand %p1037_p10, %p1031_p7 }
  0x55   :  { %1041 = shalt.err (!%p1038_p11)
}
  0x56   :  { %52 = dma.hbm_to_vmem [thread:$0]  %s1390_s2, 256, %s47_s30, [#allocation6], %s1145_s10, %s1145_s10, %s1146_s12  }
  0x57   :  { %s1151_s11 = smov [#allocation10]   ;;  %s1152_s13 = smov [#allocation13]  }
  0x58   :  { %s70_s1 = sshll.u32 %s1151_s11, 4  ;;  %s94_s14 = sshll.u32 %s1152_s13, 4  ;;  %s71_s1 = int_to_ptr.vmem [resolvable:$true] %s70_s1  ;;  %s95_s14 = int_to_ptr.vmem [resolvable:$true] %s94_s14 }
  0x59   :  { %s1042_s17 = scalar_lea.hbm %s1392_s4, 512 }
  0x5a   :  { %p1043_p12 = scmp.ne.s32.totalorder %s1392_s4, %s1042_s17  ;;  %p1046_p13 = scmp.lt.u32.totalorder %s1042_s17, %s1392_s4 }
  0x5c   :  { %p1048_p0 = pnand %p1046_p13, %p1043_p12 }
  0x5e   :  { %1051 = shalt.err (!%p1048_p0)
}
  0x5f   :  { %s1052_s2 = scalar_lea.vmem %s71_s1, 512  ;;  %p1057_p2 = scmp.lt.s32.totalorder %s71_s1, %s71_s1 }
  0x60   :  { %p1053_p1 = scmp.ne.s32.totalorder %s71_s1, %s1052_s2  ;;  %p1058_p3 = scmp.lt.s32.totalorder %s1052_s2, %s1052_s2 }
  0x62   :  { %p1059_p4 = por %p1058_p3, %p1057_p2 }
  0x64   :  { %p1060_p5 = pnand %p1059_p4, %p1053_p1 }
  0x66   :  { %1063 = shalt.err (!%p1060_p5)
}
  0x67   :  { %76 = dma.hbm_to_vmem [thread:$0]  %s1392_s4, 512, %s71_s1, [#allocation9], %s1145_s10, %s1145_s10, %s1146_s12  }
  0x68   :  { %s1064_s25 = scalar_lea.hbm %s1394_s6, 1536 }
  0x69   :  { %p1065_p6 = scmp.ne.s32.totalorder %s1394_s6, %s1064_s25  ;;  %p1068_p7 = scmp.lt.u32.totalorder %s1064_s25, %s1394_s6 }
  0x6b   :  { %p1070_p8 = pnand %p1068_p7, %p1065_p6 }
  0x6d   :  { %1073 = shalt.err (!%p1070_p8)
}
  0x6e   :  { %s1074_s28 = scalar_lea.vmem %s95_s14, 1536  ;;  %p1079_p10 = scmp.lt.s32.totalorder %s95_s14, %s95_s14 }
  0x6f   :  { %p1075_p9 = scmp.ne.s32.totalorder %s95_s14, %s1074_s28  ;;  %p1080_p11 = scmp.lt.s32.totalorder %s1074_s28, %s1074_s28 }
  0x71   :  { %p1081_p12 = por %p1080_p11, %p1079_p10 }
  0x73   :  { %p1082_p13 = pnand %p1081_p12, %p1075_p9 }
  0x75   :  { %1085 = shalt.err (!%p1082_p13)
}
  0x76   :  { %100 = dma.hbm_to_vmem [thread:$0]  %s1394_s6, 1536, %s95_s14, [#allocation12], %s1147_s3, %s1147_s3, %s1148_s22  }
  0x77   :  { %1130 = dma.done.wait [#allocation3], 128  }
  0x78   :  { %1131 = vsyncadd [#allocation3], 4294967168 }
  0x79   :  { %1132 = dma.done.wait [#allocation6], 384  }
  0x7a   :  { %1133 = vsyncadd [#allocation6], 4294966912 }
  0x7b   :  { %1134 = dma.done.wait [#allocation9], 1024  }
  0x7c   :  { %1135 = vsyncadd [#allocation9], 4294966272 }
  0x7d   :  { %1136 = dma.done.wait [#allocation12], 3072  }
  0x7e   :  { %1137 = vsyncadd [#allocation12], 4294964224  ;;  %v1153_v0 = vmov 0.0   ;;  %v1154_v1 = vmov 0.0|0.0   ;;  %vm1155_vm0 = vmmov 0   ;;  %v127_v2 = vld [vmem:[#allocation13 + $0x8] sm:$0xff] }
  0x7f   :  { %206 = vmatprep.mubr.f32.mxu0 %v1153_v0  ;;  %869 = vmatprep.subr.bf16.mxu1 %v1154_v1  ;;  %v130_v3 = vld [vmem:[#allocation13 + $0x20] sm:$0xff]  ;;  %v129_v6 = vld [vmem:[#allocation13 + $0x18] sm:$0xff]  ;;  %v136_v8 = vld [vmem:[#allocation13 + $0x50] sm:$0xff]  ;;  %vm138_vm1 = vcmask 261120   ;;  %vm296_vm2 = vcmask 130048   ;;  %s1156_s24 = smov [#allocation15]  }
  0x80   :  { %818 = vmatprep.mubr.msk.f32.mxu1 %vm1155_vm0, %v1153_v0  ;;  %v126_v4 = vld [vmem:[#allocation13] sm:$0xff]  ;;  %v861_v5 = vpack.c.bf16 %v130_v3, %v127_v2  ;;  %v133_v7 = vld [vmem:[#allocation13 + $0x38] sm:$0xff]  ;;  %v132_v11 = vld [vmem:[#allocation13 + $0x30] sm:$0xff]  ;;  %s755_s18 = sshll.u32 %s1156_s24, 4  ;;  %s756_s18 = int_to_ptr.vmem [resolvable:$true] %s755_s18 }
  0x81   :  { %v863_v9 = vpack.c.bf16 %v129_v6, %v126_v4  ;;  %v865_v10 = vpack.c.bf16 %v136_v8, %v133_v7  ;;  %v135_v12 = vld [vmem:[#allocation13 + $0x48] sm:$0xff]  ;;  %v128_v14 = vld [vmem:[#allocation13 + $0x10] sm:$0xff]  ;;  %v134_v16 = vld [vmem:[#allocation13 + $0x40] sm:$0xff]  ;;  %s1086_s19 = scalar_lea.vmem %s756_s18, 128  ;;  %p1091_p1 = scmp.lt.s32.totalorder %s756_s18, %s756_s18 }
  0x82   :  { %862 = vmatprep.subr.bf16.mxu0 %v861_v5  ;;  %v867_v13 = vpack.c.bf16 %v135_v12, %v132_v11  ;;  %v131_v15 = vld [vmem:[#allocation13 + $0x28] sm:$0xff]  ;;  %v290_v17 = vld [vmem:[#allocation7] sm:$0xff]  ;;  %v291_v18 = vld [vmem:[#allocation7 + $0x8] sm:$0xff]  ;;  %p1087_p0 = scmp.ne.s32.totalorder %s756_s18, %s1086_s19  ;;  %p1092_p2 = scmp.lt.s32.totalorder %s1086_s19, %s1086_s19 }
  0x83   :  { %864 = vmatpush1.bf16.msra.mxu0 %v863_v9  ;;  %v870_v19 = vpack.c.bf16 %v131_v15, %v128_v14  ;;  %v137_v20 = vld [vmem:[#allocation13 + $0x58] sm:$0xff]  ;;  %v1311_v22 = vld [vmem:[#allocation5] sm:$0xff]  ;;  %v876_v23 = vpack.c.bf16 %v291_v18, %v290_v17  ;;  %v373_v24 = vld [vmem:[#allocation8] sm:$0xff] }
  0x84   :  { %866 = vmatprep.subr.bf16.mxu0 %v865_v10  ;;  %v873_v21 = vpack.c.bf16 %v137_v20, %v134_v16  ;;  %v374_v25 = vld [vmem:[#allocation8 + $0x8] sm:$0xff]  ;;  %v124_v27 = vld [vmem:[#allocation2] sm:$0xff]  ;;  %v375_v28 = vld [vmem:[#allocation8 + $0x10] sm:$0xff]  ;;  %p1093_p3 = por %p1092_p2, %p1091_p1 }
  0x85   :  { %871 = vmatpush3.bf16.msra.mxu1 %v870_v19  ;;  %v879_v26 = vpack.c.bf16 %v374_v25, %v373_v24  ;;  %v376_v29 = vld [vmem:[#allocation8 + $0x18] sm:$0xff]  ;;  %v458_v31 = vld [vmem:[#allocation11 + $0x8] sm:$0xff]  ;;  %v461_v32 = vld [vmem:[#allocation11 + $0x20] sm:$0xff] }
  0x86   :  { %872 = vmatprep.subr.bf16.mxu1 %v1154_v1  ;;  %v882_v30 = vpack.c.bf16 %v376_v29, %v375_v28  ;;  %v884_v33 = vpack.c.bf16 %v461_v32, %v458_v31  ;;  %v457_v34 = vld [vmem:[#allocation11] sm:$0xff]  ;;  %v460_v35 = vld [vmem:[#allocation11 + $0x18] sm:$0xff]  ;;  %v459_v41 = vld [vmem:[#allocation11 + $0x10] sm:$0xff]  ;;  %p1094_p4 = pnand %p1093_p3, %p1087_p0 }
  0x87   :  { %868 = vmatpush1.bf16.msra.mxu0 %v867_v13  ;;  %v886_v36 = vpack.c.bf16 %v460_v35, %v457_v34  ;;  %v773_v37 = vld [vmem:[%s1395_s7] ss:$0 sm:$0xff]  ;;  %v462_v42 = vld [vmem:[#allocation11 + $0x28] sm:$0xff]  ;;  %v464_v48 = vld [vmem:[#allocation11 + $0x38] sm:$0xff] }
  0x88   :  { %875 = vmatprep.subr.bf16.mxu0 %v1154_v1  ;;  %v893_v46 = vpack.c.bf16 %v462_v42, %v459_v41  ;;  %v467_v49 = vld [vmem:[#allocation11 + $0x50] sm:$0xff]  ;;  %v466_v52 = vld [vmem:[#allocation11 + $0x48] sm:$0xff]  ;;  %v465_v53 = vld [vmem:[#allocation11 + $0x40] sm:$0xff] }
  0x89   :  { %874 = vmatpush3.bf16.msra.mxu1 %v873_v21  ;;  %v888_v50 = vpack.c.bf16 %v467_v49, %v464_v48  ;;  %v463_v51 = vld [vmem:[#allocation11 + $0x30] sm:$0xff]  ;;  %v468_v55 = vld [vmem:[#allocation11 + $0x58] sm:$0xff]  ;;  %v775_v57 = vld [vmem:[%s1395_s7 + $0x1] ss:$0 sm:$0xff] }
  0x8a   :  { %771 = vmatmul.mubr.msk.f32.vlgmr.msra.gmra.mrb[0].mxu0 %vm138_vm1, %v1311_v22  ;;  %878 = vmatprep.subr.bf16.mxu1 %v1154_v1  ;;  %v890_v54 = vpack.c.bf16 %v466_v52, %v463_v51  ;;  %v896_v56 = vpack.c.bf16 %v468_v55, %v465_v53  ;;  %v653_v63 = vld [vmem:[#allocation10] sm:$0xff]  ;;  %v654_v2 = vld [vmem:[#allocation10 + $0x8] sm:$0xff]  ;;  %v655_v4 = vld [vmem:[#allocation10 + $0x10] sm:$0xff] }
  0x8b   :  { %877 = vmatpush3.bf16.msra.mxu0 %v876_v23  ;;  %825 = vmatprep.mubr.msk.f32.mxu0 %vm1155_vm0, %v1153_v0  ;;  %v899_v3 = vpack.c.bf16 %v654_v2, %v653_v63  ;;  %v656_v5 = vld [vmem:[#allocation10 + $0x18] sm:$0xff]  ;;  %v779_v7 = vld [vmem:[%s1395_s7 + $0x3] ss:$0 sm:$0xff]  ;;  %v781_v13 = vld [vmem:[%s1395_s7 + $0x4] ss:$0 sm:$0xff] }
  0x8c   :  { %819 = vmatmul.mubr.msk.f32.vlgmr.msra.gmra.mrb[0].mxu1 %vm138_vm1, %v1311_v22  ;;  %885 = vmatprep.subr.bf16.mxu0 %v884_v33  ;;  %v902_v6 = vpack.c.bf16 %v656_v5, %v655_v4  ;;  %v784_v17 = vld [vmem:[%s1395_s7 + $0x6] ss:$0 sm:$0xff]  ;;  %v783_v18 = vld [vmem:[%s1395_s7 + $0x5] ss:$0 sm:$0xff] }
  0x8d   :  { %880 = vmatpush3.bf16.msra.mxu1 %v879_v26  ;;  %836 = vmatprep.mubr.msk.f32.mxu1 %vm1155_vm0, %v1153_v0 }
  0x8e   :  { %826 = vmatmul.mubr.msk.f32.vlgmr.msra.gmra.mrb[2].mxu0 %vm296_vm2, %v124_v27  ;;  %881 = vmatprep.subr.bf16.mxu1 %v1154_v1 }
  0x8f   :  { %536 = vmatprep.mubr.f32.mxu0 %v1153_v0  ;;  %887 = vmatpush1.bf16.msra.mxu0 %v886_v36 }
  0x90   :  { %889 = vmatprep.subr.bf16.mxu0 %v888_v50 }
  0x91   :  { %883 = vmatpush3.bf16.msra.mxu1 %v882_v30 }
  0x92   :  { %892 = vmatprep.subr.bf16.mxu1 %v1154_v1 }
  0x93   :  { %891 = vmatpush1.bf16.msra.mxu0 %v890_v54 }
  0x94   :  { %898 = vmatprep.subr.bf16.mxu0 %v1154_v1 }
 0x15f   :  { %v1330_v38 = vpop.f32.mrb[0].mxu1 }
 0x160   :  { %v820_v40 = vpop.f32.mrb[1].mxu1  ;;  %v646_v20 = vadd.f32 %v784_v17, %v1330_v38 }
 0x161   :  { %v366_v39 = vpop.f32.mrb[2].mxu0 }
 0x162   :  { %v367_v43 = vadd.f32 %v773_v37, %v366_v39  ;;  %v827_v44 = vpop.f32.mrb[3].mxu0 }
 0x164   :  { %vm370_vm3 = vcmp.gt.f32.partialorder %v367_v43, 0.0  ;;  %v371_v45 = vmul.f32 0.01, %v367_v43 }
 0x166   :  { %v372_v47 = vsel %vm370_vm3, %v367_v43, %v371_v45 }
 0x167   :  { %837 = vmatmul.mubr.msk.f32.vlgmr.msra.gmra.mrb[2].mxu1 %vm138_vm1, %v372_v47 }
 0x168   :  { %894 = vmatpush3.bf16.msra.mxu1 %v893_v46  ;;  %847 = vmatprep.mubr.msk.f32.mxu1 %vm1155_vm0, %v1153_v0 }
 0x169   :  { %895 = vmatprep.subr.bf16.mxu1 %v1154_v1 }
 0x16c   :  { %897 = vmatpush3.bf16.msra.mxu1 %v896_v56 }
 0x23a   :  { %v450_v58 = vpop.f32.mrb[2].mxu1 }
 0x23b   :  { %v451_v59 = vadd.f32 %v775_v57, %v450_v58  ;;  %v838_v60 = vpop.f32.mrb[3].mxu1 }
 0x23d   :  { %vm454_vm4 = vcmp.gt.f32.partialorder %v451_v59, 0.0  ;;  %v455_v61 = vmul.f32 0.01, %v451_v59 }
 0x23f   :  { %v456_v62 = vsel %vm454_vm4, %v451_v59, %v455_v61 }
 0x240   :  { %777 = vmatmul.mubr.msk.f32.vlgmr.msra.gmra.mrb[0].mxu0 %vm138_vm1, %v456_v62  ;;  %848 = vmatmul.mubr.msk.f32.vlgmr.msra.gmra.mrb[4].mxu1 %vm138_vm1, %v456_v62 }
 0x241   :  { %858 = vmatprep.mubr.msk.f32.mxu0 %vm1155_vm0, %v1153_v0  ;;  %900 = vmatpush3.bf16.msra.mxu0 %v899_v3 }
 0x242   :  { %901 = vmatprep.subr.bf16.mxu0 %v1154_v1 }
 0x245   :  { %903 = vmatpush3.bf16.msra.mxu0 %v902_v6 }
 0x313   :  { %v538_v8 = vpop.f32.mrb[0].mxu0  ;;  %v609_v9 = vpop.f32.mrb[4].mxu1 }
 0x314   :  { %v618_v10 = vadd.f32 %v779_v7, %v538_v8  ;;  %v540_v11 = vpop.f32.mrb[1].mxu0  ;;  %v849_v12 = vpop.f32.mrb[5].mxu1  ;;  %v641_v23 = vadd.f32 %v783_v18, %v609_v9 }
 0x315   :  { %v630_v1 = vadd.f32 %v781_v13, %v540_v11 }
 0x316   :  { %v780_v0 = vmul.f32 -1.442695, %v618_v10 }
 0x317   :  { %v782_v14 = vmul.f32 -1.442695, %v630_v1 }
 0x318   :  { %922 = vpow2.f32 %v780_v0 }
 0x319   :  { %924 = vpow2.f32 %v782_v14 }
 0x322   :  { %v923_v15 = vpop.eup %922 }
 0x323   :  { %v622_v16 = vadd.f32 1.0, %v923_v15  ;;  %v925_v19 = vpop.eup %924 }
 0x324   :  { %v634_v26 = vadd.f32 1.0, %v925_v19 }
 0x325   :  { %926 = vrcp.f32 %v622_v16 }
 0x32f   :  { %v927_v21 = vpop.eup %926 }
 0x330   :  { %v647_v24 = vmul.f32 %v927_v21, %v646_v20 }
 0x332   :  { %v648_v25 = vadd.f32 %v647_v24, %v641_v23 }
 0x334   :  { %928 = vtanh.f32 %v648_v25 }
 0x335   :  { %930 = vrcp.f32 %v634_v26 }
 0x33e   :  { %v929_v27 = vpop.eup %928 }
 0x33f   :  { %v650_v28 = vsub.f32 %v1311_v22, %v929_v27  ;;  %v931_v29 = vpop.eup %930 }
 0x341   :  { %v651_v30 = vmul.f32 %v931_v29, %v650_v28 }
 0x343   :  { %v652_v31 = vadd.f32 %v929_v27, %v651_v30 }
 0x345   :  { %859 = vmatmul.mubr.msk.f32.vlgmr.msra.gmra.mrb[4].mxu0 %vm138_vm1, %v652_v31  ;;  %738 = vst.msk [vmem:[#allocation15] sm:$0xff] %vm138_vm1, %v652_v31 }
 0x346   :  { %1097 = shalt.err (!%p1094_p4)
}
 0x347   :  { %s1098_s20 = scalar_lea.hbm %s1397_s9, 128 }
 0x348   :  { %p1099_p5 = scmp.ne.s32.totalorder %s1397_s9, %s1098_s20  ;;  %p1102_p6 = scmp.lt.u32.totalorder %s1098_s20, %s1397_s9 }
 0x34a   :  { %p1104_p7 = pnand %p1102_p6, %p1099_p5 }
 0x34c   :  { %1107 = shalt.err (!%p1104_p7)
}
 0x34d   :  { %758 = dma.vmem_to_hbm [thread:$0]  %s756_s18, 128, %s1397_s9, [#allocation16]   ;;  %v785_v22 = vld [vmem:[%s1395_s7 + $0x2] ss:$0 sm:$0xff] }
 0x34e   :  { %s1157_s4 = smov [#allocation14]  }
 0x34f   :  { %s745_s10 = sshll.u32 %s1157_s4, 4  ;;  %s746_s10 = int_to_ptr.vmem [resolvable:$true] %s745_s10 }
 0x350   :  { %s1108_s6 = scalar_lea.vmem %s746_s10, 128  ;;  %p1113_p9 = scmp.lt.s32.totalorder %s746_s10, %s746_s10 }
 0x351   :  { %p1109_p8 = scmp.ne.s32.totalorder %s746_s10, %s1108_s6  ;;  %p1114_p10 = scmp.lt.s32.totalorder %s1108_s6, %s1108_s6 }
 0x353   :  { %p1115_p11 = por %p1114_p10, %p1113_p9 }
 0x355   :  { %p1116_p12 = pnand %p1115_p11, %p1109_p8 }
 0x418   :  { %v730_v32 = vpop.f32.mrb[4].mxu0 }
 0x419   :  { %v731_v33 = vadd.f32 %v785_v22, %v730_v32  ;;  %v860_v34 = vpop.f32.mrb[5].mxu0 }
 0x41b   :  { %v735_v35 = vmul.f32 0.01, %v731_v33  ;;  %vm734_vm5 = vcmp.gt.f32.partialorder %v731_v33, 0.0 }
 0x41d   :  { %v736_v36 = vsel %vm734_vm5, %v731_v33, %v735_v35 }
 0x41e   :  { %737 = vst [vmem:[#allocation14] sm:$0xff] %v736_v36 }
 0x41f   :  { %1119 = shalt.err (!%p1116_p12)
}
 0x420   :  { %s1120_s7 = scalar_lea.hbm %s1396_s8, 128 }
 0x421   :  { %p1121_p13 = scmp.ne.s32.totalorder %s1396_s8, %s1120_s7  ;;  %p1124_p0 = scmp.lt.u32.totalorder %s1120_s7, %s1396_s8 }
 0x423   :  { %p1126_p1 = pnand %p1124_p0, %p1121_p13 }
 0x425   :  { %1129 = shalt.err (!%p1126_p1)
}
 0x426   :  { %748 = dma.vmem_to_hbm [thread:$0]  %s746_s10, 128, %s1396_s8, [#allocation4]  }
 0x427   :  { %1138 = dma.done.wait [#allocation4], 128  }
 0x428   :  { %1139 = vsyncadd [#allocation4], 4294967168 }
 0x429   :  { %1140 = dma.done.wait [#allocation16], 128  }
 0x42a   :  { %1141 = vsyncadd [#allocation16], 4294967168 }
 0x42b   :  { %765 = vsyncpa [#allocation3], 1 }
 0x42c   :  { %766 = vsyncpa [#allocation6], 1 }
 0x42d   :  { %767 = vsyncpa [#allocation9], 1 }
 0x42e   :  { %768 = vsyncpa [#allocation12], 1 }
 0x42f   :  { %769 = vsyncpa [#allocation4], 1 }
 0x430   :  { %770 = vsyncpa [#allocation16], 1 }

</bundles_post_ra>
